<compile_context>
chip_gen: v7x
topology: tpu7x:2x2x1
jax: 0.10.0
libtpu: 0.0.40
codegen_flags: <defaults>
</compile_context>

<pallas_src>
import jax
import jax.numpy as jnp
from jax.experimental import pallas as pl
from jax.experimental.pallas import tpu as pltpu


# ----------------------------------------------------------------------------
# Kernel: plain tile copy (identity).
# ----------------------------------------------------------------------------
def _copy_kernel(x_ref, o_ref):
    o_ref[...] = x_ref[...]


_LANE = 128
_MAX_LANE_WIDTH = 8192
# 4x-buffered (2 in + 2 out) footprint budget; safe under v5e's 16 MiB scoped
# VMEM default and well under v6e/v7x defaults.
_VMEM_BUDGET_BYTES = 12 * 1024 * 1024


def _sublane_pack(dtype):
    """Rows per vreg sublane group: 8 (4B), 16 (2B), 32 (1B)."""
    itemsize = jnp.dtype(dtype).itemsize
    return max(8, 32 // itemsize)


def _choose_2d_layout(x):
    """Pick a lane-dense 2D view (rows, width) of x for the copy kernel."""
    total = int(x.size)
    if total % _LANE == 0:
        # Wide, 128-multiple lane axis -> unmasked vst + long contiguous DMAs.
        width = _LANE
        while width * 2 <= _MAX_LANE_WIDTH and total % (width * 2) == 0:
            width *= 2
        return total // width, width
    # Fallback: keep the trailing model dim as the lane axis (full-extent last
    # dim is exempt from the (8,128) divisibility rule).
    width = x.shape[-1]
    return total // width, width


def esm2t_classifier_forward(x):
    """Pallas implementation of Esm2TClassifier.forward (identity).

    Materializes the output with a lane-dense, VMEM-bounded tiled HBM copy.
    (If the caller donates x, prefer returning x directly — identity needs no
    kernel at all; this kernel exists to exercise the Pallas path.)
    """
    orig_shape = x.shape
    rows, width = _choose_2d_layout(x)
    x2 = x.reshape(rows, width)

    itemsize = jnp.dtype(x.dtype).itemsize
    sub = _sublane_pack(x.dtype)

    # Largest row block whose double-buffered in+out footprint fits the budget.
    rows_by_vmem = max(1, _VMEM_BUDGET_BYTES // (4 * width * itemsize))
    if rows >= sub:
        blk = min(rows, rows_by_vmem)
        blk = max(sub, (blk // sub) * sub)   # keep sublane-packed multiples
        blk = min(blk, rows)
    else:
        blk = rows                            # full-extent block (layout-legal)

    grid = (pl.cdiv(rows, blk),)              # partial last block is fine

    out2 = pl.pallas_call(
        _copy_kernel,
        out_shape=jax.ShapeDtypeStruct((rows, width), x.dtype),
        grid=grid,
        in_specs=[pl.BlockSpec((blk, width), lambda i: (i, 0))],
        out_specs=pl.BlockSpec((blk, width), lambda i: (i, 0)),
        compiler_params=pltpu.CompilerParams(
            dimension_semantics=("parallel",),
        ),
    )(x2)
    return out2.reshape(orig_shape)


if __name__ == "__main__":
    key = jax.random.PRNGKey(0)

    # Small token-representation shape: batch=2, seq_len=8, hidden=128.
    B, L, H = 2, 8, 128
    x = jax.random.normal(key, (B, L, H), dtype=jnp.float32)
    y = jax.block_until_ready(esm2t_classifier_forward(x))
    assert y.shape == x.shape and y.dtype == x.dtype
    assert bool(jnp.all(y == x))

    # Second shape with an ESM2-like hidden size (320) to exercise the
    # wide-lane flattening path with a different factorization.
    x2 = jax.random.normal(jax.random.PRNGKey(1), (2, 8, 320), dtype=jnp.float32)
    y2 = jax.block_until_ready(esm2t_classifier_forward(x2))
    assert y2.shape == x2.shape and y2.dtype == x2.dtype
    assert bool(jnp.all(y2 == x2))

    print("KERNEL_OK")
</pallas_src>

<mosaic_0001>
module attributes {stable_mosaic.version = 11 : i64} {
  func.func @_copy_kernel(%arg0: i32, %arg1: memref<1x2048xf32, #tpu.memory_space<vmem>>, %arg2: memref<1x2048xf32, #tpu.memory_space<vmem>>) attributes {dimension_semantics = [#tpu.dimension_semantics<parallel>], iteration_bounds = array<i64: 1>, scalar_prefetch = 0 : i64, scratch_operands = 0 : i64, tpu.core_type = #tpu.core_type<tc>, window_params = [{transform_indices = @transform_0, window_bounds = array<i64: 1, 2048>}, {transform_indices = @transform_1, window_bounds = array<i64: 1, 2048>}]} {
    %c0 = arith.constant 0 : index
    %c0_0 = arith.constant 0 : index
    %0 = vector.load %arg1[%c0, %c0_0] : memref<1x2048xf32, #tpu.memory_space<vmem>>, vector<1x2048xf32>
    %c0_1 = arith.constant 0 : index
    %c0_2 = arith.constant 0 : index
    %1 = vector.load %arg2[%c0_1, %c0_2] : memref<1x2048xf32, #tpu.memory_space<vmem>>, vector<1x2048xf32>
    tpu.vector_store %arg2[%c0_1, %c0_2], %0 {strides = array<i32>} : memref<1x2048xf32, #tpu.memory_space<vmem>>, vector<1x2048xf32>,
    return
  }
  func.func @transform_0(%arg0: i32) -> (i32, i32) {
    %c0_i32 = arith.constant 0 : i32
    %c0_i32_0 = arith.constant 0 : i32
    return %arg0, %c0_i32 : i32, i32
  }
  func.func @transform_1(%arg0: i32) -> (i32, i32) {
    %c0_i32 = arith.constant 0 : i32
    %c0_i32_0 = arith.constant 0 : i32
    return %arg0, %c0_i32 : i32, i32
  }
}

</mosaic_0001>

<bundles_post_ra>
// kernel: tpu_custom_call.1
= control target key start
LH: loop header
LB: loop body
LE: loop exit
PB: predicated region body
PF: predicated region fallthrough
CT: control target
= control target key end

     0   :  { %6 = vsyncpa [#allocation3], 0  ;;  %s126_s0 = inlined_call_operand.hbm [shape: f32[1,2048], index: 0, kind: input, shape index: {}]   ;;  %s127_s1 = inlined_call_operand.hbm [shape: f32[1,2048], index: 1, kind: output, shape index: {}]  }
   0x1   :  { %7 = vsyncpa [#allocation4], 0  ;;  %s90_s6 = smov [#allocation2]   ;;  %s42_s10 = scalar_lea.hbm %s126_s0, 256 }
   0x2   :  { %s14_s7 = sshll.u32 %s90_s6, 4  ;;  %p43_p0 = scmp.ne.s32.totalorder %s126_s0, %s42_s10  ;;  %s15_s7 = int_to_ptr.vmem [resolvable:$true] %s14_s7 }
   0x3   :  { %p46_p1 = scmp.lt.u32.totalorder %s42_s10, %s126_s0 }
   0x5   :  { %p48_p2 = pnand %p46_p1, %p43_p0 }
   0x7   :  { %51 = shalt.err (!%p48_p2)
}
   0x8   :  { %s52_s15 = scalar_lea.vmem %s15_s7, 256  ;;  %p57_p4 = scmp.lt.s32.totalorder %s15_s7, %s15_s7 }
   0x9   :  { %p53_p3 = scmp.ne.s32.totalorder %s15_s7, %s52_s15  ;;  %p58_p5 = scmp.lt.s32.totalorder %s52_s15, %s52_s15 }
   0xb   :  { %p59_p6 = por %p58_p5, %p57_p4 }
   0xd   :  { %p60_p7 = pnand %p59_p6, %p53_p3 }
   0xf   :  { %63 = shalt.err (!%p60_p7)
}
  0x10   :  { %17 = dma.hbm_to_vmem [thread:$0]  %s126_s0, 256, %s15_s7, [#allocation3]  }
  0x11   :  { %86 = dma.done.wait [#allocation3], 256  }
  0x12   :  { %87 = vsyncadd [#allocation3], 4294967040  ;;  %s91_s18 = smov [#allocation5]   ;;  %v21_v0 = vld [vmem:[#allocation2] sm:$0xff]  ;;  %v22_v1 = vld [vmem:[#allocation2 + $0x8] sm:$0xff] }
  0x13   :  { %s31_s19 = sshll.u32 %s91_s18, 4  ;;  %23 = vst [vmem:[#allocation5] sm:$0xff] %v21_v0  ;;  %24 = vst [vmem:[#allocation5 + $0x8] sm:$0xff] %v22_v1  ;;  %s32_s19 = int_to_ptr.vmem [resolvable:$true] %s31_s19 }
  0x14   :  { %s64_s20 = scalar_lea.vmem %s32_s19, 256  ;;  %p69_p9 = scmp.lt.s32.totalorder %s32_s19, %s32_s19 }
  0x15   :  { %p65_p8 = scmp.ne.s32.totalorder %s32_s19, %s64_s20  ;;  %p70_p10 = scmp.lt.s32.totalorder %s64_s20, %s64_s20 }
  0x17   :  { %p71_p11 = por %p70_p10, %p69_p9 }
  0x19   :  { %p72_p12 = pnand %p71_p11, %p65_p8 }
  0x1b   :  { %75 = shalt.err (!%p72_p12)
}
  0x1c   :  { %s76_s0 = scalar_lea.hbm %s127_s1, 256 }
  0x1d   :  { %p77_p13 = scmp.ne.s32.totalorder %s127_s1, %s76_s0  ;;  %p80_p0 = scmp.lt.u32.totalorder %s76_s0, %s127_s1 }
  0x1f   :  { %p82_p1 = pnand %p80_p0, %p77_p13 }
  0x21   :  { %85 = shalt.err (!%p82_p1)
}
  0x22   :  { %34 = dma.vmem_to_hbm [thread:$0]  %s32_s19, 256, %s127_s1, [#allocation4]  }
  0x23   :  { %88 = dma.done.wait [#allocation4], 256  }
  0x24   :  { %89 = vsyncadd [#allocation4], 4294967040 }
  0x25   :  { %38 = vsyncpa [#allocation3], 1 }
  0x26   :  { %39 = vsyncpa [#allocation4], 1 }

</bundles_post_ra>
